<compile_context>
chip_gen: v7x
topology: tpu7x:2x2x1
jax: 0.10.0
libtpu: 0.0.40
codegen_flags: <defaults>
</compile_context>

<pallas_src>
import numpy as np
import jax
import jax.numpy as jnp
from jax.experimental import pallas as pl
from jax.experimental.pallas import tpu as pltpu


def _round_up(n, m):
    return ((n + m - 1) // m) * m


def _make_kernel(use_mxu: bool, vp: int, vc: int, d: int, num_fields: int):
    n_chunks = vp // vc

    def kernel(off_ref, x_ref, emb_ref, bias_ref, out_ref):
        # off_ref : (F,)     int32  SMEM (scalar prefetch)
        # x_ref   : (TB, F)  int32  natural-layout block of x
        # emb_ref : (D, Vp)  f32 if use_mxu else (Vp, 1) f32
        # bias_ref: (D, 1)   f32
        # out_ref : (D, TB)  f32    lane-dense output tile
        tb = out_ref.shape[1]

        # Tiny per-tile transpose (XLU): batch moves onto the 128-wide lane axis.
        xt = x_ref[...].T                                        # (F, TB) int32
        # Fold per-field vocab offsets: scalar SMEM reads + cheap VPU adds.
        ids = [xt[f:f + 1, :] + off_ref[f] for f in range(num_fields)]

        iota0 = jax.lax.broadcasted_iota(jnp.int32, (vc, tb), 0)  # (VC, TB)

        acc = jnp.zeros((d, tb), jnp.float32)
        for c in range(n_chunks):                 # static, small unrolled loop
            iota_c = iota0 + c * vc
            # counts[v, b] = #{f : id_f[b] == v}; int32 accumulation, one cast.
            cnt = (iota_c == ids[0]).astype(jnp.int32)
            for f in range(1, num_fields):
                cnt = cnt + (iota_c == ids[f]).astype(jnp.int32)
            cnt_f = cnt.astype(jnp.float32)
            if use_mxu:
                # (D, VC) @ (VC, TB) -> (D, TB) on the MXU.
                acc = acc + jnp.dot(emb_ref[:, c * vc:(c + 1) * vc], cnt_f,
                                    preferred_element_type=jnp.float32)
            else:
                # D == 1: VPU multiply + sublane reduce; skip a 1-row MXU pass.
                acc = acc + jnp.sum(emb_ref[c * vc:(c + 1) * vc, :] * cnt_f,
                                    axis=0, keepdims=True)

        out_ref[...] = acc + bias_ref[...]

    return kernel


def prepare_features_linear_params(emb, bias, *, mxu_min_d=2):
    """Pad / lay out the embedding table ONCE (hoist out of the step loop).

    emb: (V, D) f32, bias: (D,) f32.
    mxu_min_d: smallest D that uses the MXU path; D below it uses the VPU.
    (Crossover is generation-dependent; 2 is a safe default, consider ~8-16 on
    v5e/v6e where a skinny matmul badly underfills the MXU rows.)
    """
    V, D = emb.shape
    use_mxu = D >= mxu_min_d
    # Vocab padded to a multiple of 8 (sublanes); once large, to a multiple of
    # 128 so any power-of-two vocab chunk divides it evenly.
    Vp = max(8, _round_up(V, 8))
    if Vp > 128:
        Vp = _round_up(Vp, 128)
    emb_f32 = jnp.zeros((Vp, D), jnp.float32).at[:V, :].set(emb.astype(jnp.float32))
    emb_in = emb_f32.T if use_mxu else emb_f32          # (D, Vp) or (Vp, 1)
    bias_col = bias.astype(jnp.float32).reshape(D, 1)
    return dict(emb_in=emb_in, bias_col=bias_col, V=V, Vp=Vp, D=D, use_mxu=use_mxu)


def features_linear_prepared(x, offsets, params, *, tile_b=512, transpose_out=True):
    """x: (B, F) int; offsets: (F,) int; params from prepare_features_linear_params.

    Returns (B, D) f32 = sum_f emb[x + offsets][:, f, :] + bias
    (or the lane-dense (D, B) layout if transpose_out=False).
    tile_b: batch tile (lane axis inside the kernel), multiple of 128.
    """
    B, F = x.shape
    Vp, D, use_mxu = params["Vp"], params["D"], params["use_mxu"]
    emb_in, bias_col = params["emb_in"], params["bias_col"]

    # --- batch tiling -------------------------------------------------------
    tile_b = max(128, (tile_b // 128) * 128)
    bp_min = _round_up(B, 128)
    if bp_min <= tile_b:
        tile_b = bp_min            # single full-batch step; don't split tiny B
    n_tiles = pl.cdiv(B, tile_b)   # >= 2 for large B -> megacore sharding (v7x)
    Bp = n_tiles * tile_b

    xi = x.astype(jnp.int32)
    if Bp != B:
        # Pad rows are valid ids (0 + offset); their outputs are sliced off.
        xi = jnp.pad(xi, ((0, Bp - B), (0, 0)))

    # --- vocab chunking: keep the (vc, tile_b) one-hot within ~16 vregs ------
    vc_max = max(8, min(128, (16 * 1024) // tile_b))
    if Vp <= vc_max:
        vc = Vp
    else:
        vc = max(c for c in range(8, vc_max + 1, 8) if Vp % c == 0)
    assert Vp % vc == 0

    off = offsets.astype(jnp.int32).reshape(F)

    if use_mxu:
        emb_spec = pl.BlockSpec((D, Vp), lambda i, o: (0, 0))
    else:
        emb_spec = pl.BlockSpec((Vp, D), lambda i, o: (0, 0))

    # --- VMEM budget (double-buffered x/out, resident emb/bias, chunk temps) -
    lane = 128
    est = (2 * tile_b * _round_up(F, lane) * 4          # x blocks (lane-padded)
           + 2 * _round_up(D, 8) * tile_b * 4           # out blocks
           + _round_up(D, 8) * max(Vp, lane) * 4        # emb (resident, fetched once)
           + 8 * lane * 4                               # bias
           + 3 * vc * tile_b * 4)                       # counts / iota / acc
    compiler_kwargs = dict(dimension_semantics=("parallel",))
    if est > 16 * 2 ** 20:                              # v5e scoped default floor
        compiler_kwargs["vmem_limit_bytes"] = int(min(64 * 2 ** 20, 2 * est))

    out_t = pl.pallas_call(
        _make_kernel(use_mxu, Vp, vc, D, F),
        out_shape=jax.ShapeDtypeStruct((D, Bp), jnp.float32),
        grid_spec=pltpu.PrefetchScalarGridSpec(
            num_scalar_prefetch=1,                          # offsets -> SMEM
            grid=(n_tiles,),
            in_specs=[
                pl.BlockSpec((tile_b, F), lambda i, o: (i, 0)),  # x, natural layout
                emb_spec,                 # constant block index -> DMA'd once
                pl.BlockSpec((D, 1), lambda i, o: (0, 0)),       # bias
            ],
            out_specs=pl.BlockSpec((D, tile_b), lambda i, o: (0, i)),
        ),
        compiler_params=pltpu.CompilerParams(**compiler_kwargs),
    )(off, xi, emb_in, bias_col)

    if not transpose_out:
        return out_t[:, :B]            # lane-dense (D, B) for fused consumers
    return out_t[:, :B].T              # slice BEFORE the relayout transpose


def features_linear(x, offsets, emb, bias, *, tile_b=512, transpose_out=True,
                    mxu_min_d=2):
    """One-shot convenience wrapper.  In a step loop, call
    prepare_features_linear_params once and reuse it instead."""
    params = prepare_features_linear_params(emb, bias, mxu_min_d=mxu_min_d)
    return features_linear_prepared(x, offsets, params, tile_b=tile_b,
                                    transpose_out=transpose_out)


if __name__ == "__main__":
    # Module config: field_dims -> vocab size V = sum(field_dims)
    field_dims = np.array([3, 5, 7, 9], dtype=np.int32)   # F = 4, V = 24
    F = len(field_dims)
    V = int(field_dims.sum())
    offsets = jnp.asarray(
        np.array((0, *np.cumsum(field_dims)[:-1]), dtype=np.int32))

    key = jax.random.PRNGKey(0)
    k_emb1, k_emb2, k_bias2, k_x = jax.random.split(key, 4)

    def make_x(k, batch):
        return jnp.stack(
            [jax.random.randint(jax.random.fold_in(k, f), (batch,), 0,
                                int(field_dims[f])) for f in range(F)],
            axis=1).astype(jnp.int32)

    def reference(x, emb, bias):
        return jnp.sum(emb[x + offsets[None, :]], axis=1) + bias[None, :]

    B = 1024                     # 2 grid steps at tile_b=512 -> both v7x TCs busy
    x = make_x(k_x, B)

    # --- output_dim = 1 (module default): VPU weighted-sum path ---
    emb1 = jax.random.normal(k_emb1, (V, 1), dtype=jnp.float32) * 0.1
    bias1 = jnp.zeros((1,), dtype=jnp.float32)
    p1 = prepare_features_linear_params(emb1, bias1)     # hoisted (once per loop)
    out1 = jax.block_until_ready(features_linear_prepared(x, offsets, p1))
    np.testing.assert_allclose(np.asarray(out1),
                               np.asarray(reference(x, emb1, bias1)),
                               rtol=1e-5, atol=1e-5)

    # --- output_dim = 8: MXU matmul path ---
    emb2 = jax.random.normal(k_emb2, (V, 8), dtype=jnp.float32) * 0.1
    bias2 = jax.random.normal(k_bias2, (8,), dtype=jnp.float32) * 0.01
    p2 = prepare_features_linear_params(emb2, bias2)
    out2 = jax.block_until_ready(features_linear_prepared(x, offsets, p2))
    np.testing.assert_allclose(np.asarray(out2),
                               np.asarray(reference(x, emb2, bias2)),
                               rtol=1e-5, atol=1e-5)

    # --- ragged batch: pads to one full tile, single grid step ---
    x3 = make_x(jax.random.fold_in(k_x, 99), 300)
    out3 = jax.block_until_ready(features_linear_prepared(x3, offsets, p2))
    np.testing.assert_allclose(np.asarray(out3),
                               np.asarray(reference(x3, emb2, bias2)),
                               rtol=1e-5, atol=1e-5)

    print("KERNEL_OK")
</pallas_src>

<mosaic_0001>
module attributes {stable_mosaic.version = 11 : i64} {
  func.func @kernel(%arg0: i32, %arg1: memref<4xi32, #tpu.memory_space<smem>>, %arg2: memref<512x4xi32, #tpu.memory_space<vmem>>, %arg3: memref<24x1xf32, #tpu.memory_space<vmem>>, %arg4: memref<1x1xf32, #tpu.memory_space<vmem>>, %arg5: memref<1x512xf32, #tpu.memory_space<vmem>>) attributes {dimension_semantics = [#tpu.dimension_semantics<parallel>], iteration_bounds = array<i64: 2>, scalar_prefetch = 1 : i64, scratch_operands = 0 : i64, tpu.core_type = #tpu.core_type<tc>, window_params = [{transform_indices = @transform_0, window_bounds = array<i64: 512, 4>}, {pipeline_mode = #tpu.pipeline_mode<synchronous>, transform_indices = @transform_1, window_bounds = array<i64: 24, 1>}, {pipeline_mode = #tpu.pipeline_mode<synchronous>, transform_indices = @transform_2, window_bounds = array<i64: 1, 1>}, {transform_indices = @transform_3, window_bounds = array<i64: 1, 512>}]} {
    %c0 = arith.constant 0 : index
    %c0_0 = arith.constant 0 : index
    %0 = vector.load %arg2[%c0, %c0_0] : memref<512x4xi32, #tpu.memory_space<vmem>>, vector<512x4xi32>
    %1 = tpu.transpose %0, [1, 0] : vector<512x4xi32> -> vector<4x512xi32>
    %2 = vector.extract_strided_slice %1 {offsets = [0, 0], sizes = [1, 512], strides = [1, 1]} : vector<4x512xi32> to vector<1x512xi32>
    %c0_1 = arith.constant 0 : index
    %3 = memref.load %arg1[%c0_1] : memref<4xi32, #tpu.memory_space<smem>>
    %4 = vector.broadcast %3 : i32 to vector<1x512xi32>
    %5 = arith.addi %2, %4 : vector<1x512xi32>
    %6 = vector.extract_strided_slice %1 {offsets = [1, 0], sizes = [1, 512], strides = [1, 1]} : vector<4x512xi32> to vector<1x512xi32>
    %c1 = arith.constant 1 : index
    %7 = memref.load %arg1[%c1] : memref<4xi32, #tpu.memory_space<smem>>
    %8 = vector.broadcast %7 : i32 to vector<1x512xi32>
    %9 = arith.addi %6, %8 : vector<1x512xi32>
    %10 = vector.extract_strided_slice %1 {offsets = [2, 0], sizes = [1, 512], strides = [1, 1]} : vector<4x512xi32> to vector<1x512xi32>
    %c2 = arith.constant 2 : index
    %11 = memref.load %arg1[%c2] : memref<4xi32, #tpu.memory_space<smem>>
    %12 = vector.broadcast %11 : i32 to vector<1x512xi32>
    %13 = arith.addi %10, %12 : vector<1x512xi32>
    %14 = vector.extract_strided_slice %1 {offsets = [3, 0], sizes = [1, 512], strides = [1, 1]} : vector<4x512xi32> to vector<1x512xi32>
    %c3 = arith.constant 3 : index
    %15 = memref.load %arg1[%c3] : memref<4xi32, #tpu.memory_space<smem>>
    %16 = vector.broadcast %15 : i32 to vector<1x512xi32>
    %17 = arith.addi %14, %16 : vector<1x512xi32>
    %18 = tpu.iota {dimensions = array<i32: 0>} : vector<24x512xi32>
    %cst = arith.constant 0.000000e+00 : f32
    %19 = vector.broadcast %cst : f32 to vector<1x512xf32>
    %c0_i32 = arith.constant 0 : i32
    %20 = vector.broadcast %c0_i32 : i32 to vector<24x512xi32>
    %21 = arith.addi %18, %20 : vector<24x512xi32>
    %22 = vector.broadcast %5 : vector<1x512xi32> to vector<24x512xi32>
    %23 = arith.cmpi eq, %21, %22 : vector<24x512xi32>
    %24 = arith.extui %23 : vector<24x512xi1> to vector<24x512xi32>
    %25 = vector.broadcast %9 : vector<1x512xi32> to vector<24x512xi32>
    %26 = arith.cmpi eq, %21, %25 : vector<24x512xi32>
    %27 = arith.extui %26 : vector<24x512xi1> to vector<24x512xi32>
    %28 = arith.addi %24, %27 : vector<24x512xi32>
    %29 = vector.broadcast %13 : vector<1x512xi32> to vector<24x512xi32>
    %30 = arith.cmpi eq, %21, %29 : vector<24x512xi32>
    %31 = arith.extui %30 : vector<24x512xi1> to vector<24x512xi32>
    %32 = arith.addi %28, %31 : vector<24x512xi32>
    %33 = vector.broadcast %17 : vector<1x512xi32> to vector<24x512xi32>
    %34 = arith.cmpi eq, %21, %33 : vector<24x512xi32>
    %35 = arith.extui %34 : vector<24x512xi1> to vector<24x512xi32>
    %36 = arith.addi %32, %35 : vector<24x512xi32>
    %37 = arith.sitofp %36 : vector<24x512xi32> to vector<24x512xf32>
    %c0_2 = arith.constant 0 : index
    %c0_3 = arith.constant 0 : index
    %38 = vector.load %arg3[%c0_2, %c0_3] : memref<24x1xf32, #tpu.memory_space<vmem>>, vector<24x1xf32>
    %39 = vector.broadcast %38 : vector<24x1xf32> to vector<24x512xf32>
    %40 = arith.mulf %39, %37 : vector<24x512xf32>
    %cst_4 = arith.constant dense<0.000000e+00> : vector<512xf32>
    %41 = vector.multi_reduction <add>, %40, %cst_4 [0] : vector<24x512xf32> to vector<512xf32>
    %42 = vector.shape_cast %41 : vector<512xf32> to vector<1x512xf32>
    %43 = arith.addf %19, %42 : vector<1x512xf32>
    %c0_5 = arith.constant 0 : index
    %c0_6 = arith.constant 0 : index
    %44 = vector.load %arg4[%c0_5, %c0_6] : memref<1x1xf32, #tpu.memory_space<vmem>>, vector<1x1xf32>
    %45 = vector.broadcast %44 : vector<1x1xf32> to vector<1x512xf32>
    %46 = arith.addf %43, %45 : vector<1x512xf32>
    %c0_7 = arith.constant 0 : index
    %c0_8 = arith.constant 0 : index
    %47 = vector.load %arg5[%c0_7, %c0_8] : memref<1x512xf32, #tpu.memory_space<vmem>>, vector<1x512xf32>
    tpu.vector_store %arg5[%c0_7, %c0_8], %46 {strides = array<i32>} : memref<1x512xf32, #tpu.memory_space<vmem>>, vector<1x512xf32>,
    return
  }
  func.func @transform_0(%arg0: i32, %arg1: memref<4xi32, #tpu.memory_space<smem>>) -> (i32, i32) {
    %c0_i32 = arith.constant 0 : i32
    %c0_i32_0 = arith.constant 0 : i32
    return %arg0, %c0_i32 : i32, i32
  }
  func.func @transform_1(%arg0: i32, %arg1: memref<4xi32, #tpu.memory_space<smem>>) -> (i32, i32) {
    %c0_i32 = arith.constant 0 : i32
    %c0_i32_0 = arith.constant 0 : i32
    %c0_i32_1 = arith.constant 0 : i32
    return %c0_i32, %c0_i32_0 : i32, i32
  }
  func.func @transform_2(%arg0: i32, %arg1: memref<4xi32, #tpu.memory_space<smem>>) -> (i32, i32) {
    %c0_i32 = arith.constant 0 : i32
    %c0_i32_0 = arith.constant 0 : i32
    %c0_i32_1 = arith.constant 0 : i32
    return %c0_i32, %c0_i32_0 : i32, i32
  }
  func.func @transform_3(%arg0: i32, %arg1: memref<4xi32, #tpu.memory_space<smem>>) -> (i32, i32) {
    %c0_i32 = arith.constant 0 : i32
    %c0_i32_0 = arith.constant 0 : i32
    return %c0_i32, %arg0 : i32, i32
  }
}

</mosaic_0001>

<bundles_post_ra>
// kernel: tpu_custom_call.1
= control target key start
LH: loop header
LB: loop body
LE: loop exit
PB: predicated region body
PF: predicated region fallthrough
CT: control target
= control target key end

     0   :  { %s1370_s0 = inlined_call_operand.vmem [shape: s32[4], index: 0, kind: input, shape index: {}]   ;;  %s1371_s1 = inlined_call_operand.vmem [shape: s32[1024,4], index: 1, kind: input, shape index: {}]   ;;  %s1372_s2 = inlined_call_operand.vmem [shape: f32[24,1], index: 2, kind: input, shape index: {}]   ;;  %s1373_s4 = inlined_call_operand.hbm [shape: f32[1,1024], index: 4, kind: output, shape index: {}]   ;;  %s1374_s3 = inlined_call_operand.<no memory space> [shape: f32[1,1], index: 3, kind: input, shape index: {}]  }
   0x1   :  { %s9_s17 = sshll.u32 %s1370_s0, 4  ;;  %v13_v0 = vstv %s1374_s3  ;;  %s10_s17 = int_to_ptr.vmem [resolvable:$true] %s9_s17 }
   0x2   :  { %14 = vst [vmem:[#allocation4] sm:$0x1] %v13_v0  ;;  %s857_s20 = scalar_lea.vmem %s10_s17, 16  ;;  %p862_p1 = scmp.lt.s32.totalorder %s10_s17, %s10_s17 }
   0x3   :  { %p858_p0 = scmp.ne.s32.totalorder %s10_s17, %s857_s20  ;;  %p863_p2 = scmp.lt.s32.totalorder %s857_s20, %s857_s20 }
   0x5   :  { %p864_p3 = por %p863_p2, %p862_p1 }
   0x7   :  { %p865_p4 = pnand %p864_p3, %p858_p0 }
   0x9   :  { %868 = shalt.err (!%p865_p4)  }
   0xa   :  { %s935_s21 = smov [#allocation3]  }
   0xb   :  { %12 = dma.vmem_to_smem %s10_s17, 16, %s935_s21, [#allocation2] }
   0xc   :  { %913 = dma.done.wait [#allocation2], 16 }
   0xd   :  { %914 = vsyncadd [#allocation2], 4294967280 }
   0xe   :  { %16 = sfence }
   0xf   :  { %17 = vsyncpa [#allocation6], 0 }
  0x10   :  { %19 = vsyncpa [#allocation6 + $0x1], 0  ;;  %s970_s0 = smov 0   ;;  %s972_s22 = smov 0  }
  0x11   :  { %s974_s3 = smov 0   ;;  %s976_s23 = smov 0  }
  0x12 LB: > { %s796_s24 = sadd.s32 4294967295, %s933_s23   ;;  %s797_s25 = sadd.s32 4294967294, %s933_s23   ;;  %s933_s23 = sphi %s976_s23, %s1380_s23   ;;  %s929_s3 = sphi %s974_s3, %s1379_s3   ;;  %s925_s22 = sphi %s972_s22, %s1378_s22   ;;  %s921_s0 = sphi %s970_s0, %s1377_s0  }
  0x13   : > { %s993_s26 = sadd.s32 1, %s933_s23   ;;  %s100_s27 = sadd.s32 1, %s929_s3 }
  0x14   : > { %s97_s28 = ssub.s32 %s933_s23, %s993_s26  ;;  %p110_p5 = scmp.ne.s32.totalorder %s929_s3, %s925_s22 }
  0x15   : > { %p98_p6 = scmp.eq.s32.totalorder %s97_s28, 0  ;;  %p111_p7 = scmp.eq.s32.totalorder %s796_s24, 1 }
  0x16   : > { %p116_p8 = scmp.ne.s32.totalorder %s925_s22, %s921_s0  ;;  %p117_p9 = scmp.eq.s32.totalorder %s797_s25, 1 }
  0x17   : > { %s1003_s29 = scalar_select %p98_p6, %s929_s3, %s100_s27  }
  0x18   : > { %p1005_p10 = por %p111_p7, %p110_p5  ;;  %p1009_p11 = por %p117_p9, %p116_p8 }
  0x19   : > { %p800_p12 = scmp.ge.s32.totalorder %s933_s23, 1  ;;  %p150_p13 = scmp.lt.s32.totalorder %s933_s23, 3 }
  0x1b   : > { %p151_p0 = pnand %p800_p12, %p150_p13 }
  0x1c   : > { %v609_v1 = vld [vmem:[%s1372_s2] sm:$0xff] (!%p151_p0)  ;;  %s1018_s8 = sshll.u32 (!%p151_p0), %s796_s24, 6  ;;  %v936_v2 = vmov (!%p151_p0), 0   ;;  %v610_v3 = vld [vmem:[%s1372_s2 + $0x8] sm:$0xff] (!%p151_p0)  ;;  %v611_v5 = vld [vmem:[%s1372_s2 + $0x10] sm:$0xff] (!%p151_p0)  ;;  %s373_s18 = sld [smem:[#allocation3]] (!%p151_p0) }
  0x1d   : > { %154 = sbr.rel (%p151_p0) target bundleno = 361 (0x169), region = 32  ;;  %855 = vset.pattern.permute.xlu1 (!%p151_p0), %v936_v2  ;;  %p175_p1 = scmp.lt.s32.totalorder (!%p151_p0), %s1018_s8, 127 }
  0x1e   : > { %614 = vperm.xlu1 (!%p151_p0), %855, %v609_v1   ;;  %s804_s19 = sld [smem:[#allocation3 + $0x1]] (!%p151_p0)  ;;  %s805_s20 = sld [smem:[#allocation3 + $0x2]] (!%p151_p0) }
  0x1f   : > { %s806_s21 = sld [smem:[#allocation3 + $0x3]] (!%p151_p0)  ;;  %s171_s24 = sand.u32 (!%p151_p0), 1, %s925_s22  }
  0x20   : > { %s801_s25 = sshll.u32 (!%p151_p0), %s171_s24, 2  ;;  %s1328_s9 = scalar_lea.hbm (!%p151_p0), %s1373_s4, %s1018_s8 }
  0x21   : > { %s173_s27 = scalar_lea.vmem (!%p151_p0), [#allocation5], %s801_s25  ;;  %s724_s10 = scalar_lea.sflag (!%p151_p0), [#allocation6], %s171_s24 }
  0x22   : > { %619 = vperm.xlu1 (!%p151_p0), %855, %v610_v3   ;;  %s738_s28 = sshll.u32 (!%p151_p0), %s173_s27, 4  ;;  %s1330_s28 = int_to_ptr.vmem [resolvable:$true] %s738_s28 }
  0x24   : > { %s176_s11 = scalar_select %p175_p1, %s1018_s8, 127 }
  0x26   : > { %s803_s12 = sshll.u32 %s176_s11, 3  ;;  %624 = vperm.xlu1 %855, %v611_v5   ;;  %v675_v5 = vld [vmem:[#allocation4] sm:$0x1]  ;;  %s869_s11 = scalar_lea.vmem %s1330_s28, 64 }
  0x27   : > { %s1029_s15 = scalar_lea.vmem %s1371_s1, %s803_s12  ;;  %p870_p2 = scmp.ne.s32.totalorder %s1330_s28, %s869_s11 }
  0x28   : > { %v181_v4 = vld [vmem:[%s1029_s15] sm:$0xff]  ;;  %v182_v6 = vld [vmem:[%s1029_s15 + $0x8] sm:$0xff]  ;;  %v183_v7 = vld [vmem:[%s1029_s15 + $0x10] sm:$0xff]  ;;  %s938_s12 = smov [#allocation5]  }
  0x29   : > { %245 = vxpose.xlu0.b32.start [1/16] (narrow) %v181_v4, 8  ;;  %v184_v8 = vld [vmem:[%s1029_s15 + $0x18] sm:$0xff]  ;;  %v185_v9 = vld [vmem:[%s1029_s15 + $0x20] sm:$0xff]  ;;  %v186_v10 = vld [vmem:[%s1029_s15 + $0x28] sm:$0xff]  ;;  %p871_p3 = pnand %p870_p2, %p1005_p10  ;;  %s873_s13 = sshll.u32 %s938_s12, 4  ;;  %s874_s13 = int_to_ptr.vmem [resolvable:$false] %s873_s13 }
  0x2a   : > { %v187_v11 = vld [vmem:[%s1029_s15 + $0x30] sm:$0xff]  ;;  %v188_v12 = vld [vmem:[%s1029_s15 + $0x38] sm:$0xff]  ;;  %v189_v13 = vld [vmem:[%s1029_s15 + $0x40] sm:$0xff]  ;;  %s875_s14 = scalar_lea.vmem %s874_s13, 128  ;;  %p876_p5 = scmp.lt.s32.totalorder %s1330_s28, %s874_s13 }
  0x2b   : > { %v190_v14 = vld [vmem:[%s1029_s15 + $0x48] sm:$0xff]  ;;  %v191_v15 = vld [vmem:[%s1029_s15 + $0x50] sm:$0xff]  ;;  %v197_v16 = vld [vmem:[%s1029_s15 + $0x80] sm:$0xff]  ;;  %p872_p4 = pneg %p871_p3  ;;  %p877_p6 = scmp.lt.s32.totalorder %s875_s14, %s869_s11 }
  0x2c   : > { %v192_v17 = vld [vmem:[%s1029_s15 + $0x58] sm:$0xff]  ;;  %v198_v18 = vld [vmem:[%s1029_s15 + $0x88] sm:$0xff]  ;;  %v193_v19 = vld [vmem:[%s1029_s15 + $0x60] sm:$0xff] }
  0x2d   : > { %246 = vxpose.xlu0.b32.cont [2/16] (narrow) %v182_v6, 8  ;;  %v199_v20 = vld [vmem:[%s1029_s15 + $0x90] sm:$0xff]  ;;  %v194_v21 = vld [vmem:[%s1029_s15 + $0x68] sm:$0xff]  ;;  %v200_v22 = vld [vmem:[%s1029_s15 + $0x98] sm:$0xff]  ;;  %p878_p7 = por %p877_p6, %p876_p5 }
  0x2e   : > { %v195_v23 = vld [vmem:[%s1029_s15 + $0x70] sm:$0xff]  ;;  %v201_v24 = vld [vmem:[%s1029_s15 + $0xa0] sm:$0xff]  ;;  %v196_v25 = vld [vmem:[%s1029_s15 + $0x78] sm:$0xff] }
  0x2f   : > { %v202_v26 = vld [vmem:[%s1029_s15 + $0xa8] sm:$0xff]  ;;  %v213_v27 = vld [vmem:[%s1029_s15 + $0x100] sm:$0xff]  ;;  %v203_v28 = vld [vmem:[%s1029_s15 + $0xb0] sm:$0xff]  ;;  %p879_p8 = pnand %p878_p7, %p872_p4 }
  0x30   : > { %v214_v29 = vld [vmem:[%s1029_s15 + $0x108] sm:$0xff]  ;;  %v204_v30 = vld [vmem:[%s1029_s15 + $0xb8] sm:$0xff]  ;;  %v215_v31 = vld [vmem:[%s1029_s15 + $0x110] sm:$0xff] }
  0x31   : > { %247 = vxpose.xlu0.b32.cont [3/16] (narrow) %v183_v7, 8  ;;  %v205_v32 = vld [vmem:[%s1029_s15 + $0xc0] sm:$0xff]  ;;  %v216_v33 = vld [vmem:[%s1029_s15 + $0x118] sm:$0xff]  ;;  %v206_v34 = vld [vmem:[%s1029_s15 + $0xc8] sm:$0xff]  ;;  %v397_v7 = vlaneseq }
  0x32   : > { %v217_v35 = vld [vmem:[%s1029_s15 + $0x120] sm:$0xff]  ;;  %v207_v36 = vld [vmem:[%s1029_s15 + $0xd0] sm:$0xff]  ;;  %v218_v37 = vld [vmem:[%s1029_s15 + $0x128] sm:$0xff] }
  0x33   : > { %v208_v38 = vld [vmem:[%s1029_s15 + $0xd8] sm:$0xff]  ;;  %v219_v39 = vld [vmem:[%s1029_s15 + $0x130] sm:$0xff]  ;;  %v209_v40 = vld [vmem:[%s1029_s15 + $0xe0] sm:$0xff] }
  0x34   : > { %v220_v41 = vld [vmem:[%s1029_s15 + $0x138] sm:$0xff]  ;;  %v210_v42 = vld [vmem:[%s1029_s15 + $0xe8] sm:$0xff]  ;;  %v221_v43 = vld [vmem:[%s1029_s15 + $0x140] sm:$0xff] }
  0x35   : > { %248 = vxpose.xlu0.b32.cont [4/16] (narrow) %v184_v8, 8  ;;  %v211_v44 = vld [vmem:[%s1029_s15 + $0xf0] sm:$0xff]  ;;  %v222_v45 = vld [vmem:[%s1029_s15 + $0x148] sm:$0xff]  ;;  %v212_v46 = vld [vmem:[%s1029_s15 + $0xf8] sm:$0xff] }
  0x36   : > { %v223_v47 = vld [vmem:[%s1029_s15 + $0x150] sm:$0xff]  ;;  %v229_v48 = vld [vmem:[%s1029_s15 + $0x180] sm:$0xff]  ;;  %v224_v49 = vld [vmem:[%s1029_s15 + $0x158] sm:$0xff] }
  0x37   : > { %v230_v50 = vld [vmem:[%s1029_s15 + $0x188] sm:$0xff]  ;;  %v225_v51 = vld [vmem:[%s1029_s15 + $0x160] sm:$0xff]  ;;  %v231_v52 = vld [vmem:[%s1029_s15 + $0x190] sm:$0xff] }
  0x38   : > { %v226_v53 = vld [vmem:[%s1029_s15 + $0x168] sm:$0xff]  ;;  %v232_v54 = vld [vmem:[%s1029_s15 + $0x198] sm:$0xff]  ;;  %v227_v55 = vld [vmem:[%s1029_s15 + $0x170] sm:$0xff] }
  0x39   : > { %249 = vxpose.xlu0.b32.cont [5/16] (narrow) %v185_v9, 8  ;;  %v233_v56 = vld [vmem:[%s1029_s15 + $0x1a0] sm:$0xff]  ;;  %v228_v57 = vld [vmem:[%s1029_s15 + $0x178] sm:$0xff]  ;;  %v234_v58 = vld [vmem:[%s1029_s15 + $0x1a8] sm:$0xff]  ;;  %v1102_v9 = vshrl.u32 %v397_v7, 7 }
  0x3a   : > { %v235_v59 = vld [vmem:[%s1029_s15 + $0x1b0] sm:$0xff]  ;;  %v236_v60 = vld [vmem:[%s1029_s15 + $0x1b8] sm:$0xff]  ;;  %v237_v61 = vld [vmem:[%s1029_s15 + $0x1c0] sm:$0xff] }
  0x3b   : > { %v238_v62 = vld [vmem:[%s1029_s15 + $0x1c8] sm:$0xff]  ;;  %v239_v63 = vld [vmem:[%s1029_s15 + $0x1d0] sm:$0xff]  ;;  %v240_v0 = vld [vmem:[%s1029_s15 + $0x1d8] sm:$0xff] }
  0x3c   : > { %v241_v1 = vld [vmem:[%s1029_s15 + $0x1e0] sm:$0xff]  ;;  %v242_v3 = vld [vmem:[%s1029_s15 + $0x1e8] sm:$0xff]  ;;  %v243_v4 = vld [vmem:[%s1029_s15 + $0x1f0] sm:$0xff] }
  0x3d   : > { %250 = vxpose.xlu0.b32.cont [6/16] (narrow) %v186_v10, 8  ;;  %v244_v6 = vld [vmem:[%s1029_s15 + $0x1f8] sm:$0xff]  ;;  %v1104_v10 = vstv %s373_s18 }
  0x41   : > { %251 = vxpose.xlu0.b32.cont [7/16] (narrow) %v187_v11, 8  ;;  %v1106_v11 = vstv %s804_s19 }
  0x45   : > { %252 = vxpose.xlu0.b32.cont [8/16] (narrow) %v188_v12, 8 }
  0x49   : > { %253 = vxpose.xlu0.b32.cont [9/16] (narrow) %v189_v13, 8 }
  0x4d   : > { %254 = vxpose.xlu0.b32.cont [10/16] (narrow) %v190_v14, 8  ;;  %v1111_v14 = vsub.s32 0, %v1102_v9 }
  0x4f   : > { %277 = vxpose.xlu1.b32.start [1/16] (narrow) %v197_v16, 8 }
  0x51   : > { %255 = vxpose.xlu0.b32.cont [11/16] (narrow) %v191_v15, 8  ;;  %v1114_v15 = vsub.s32 1, %v1102_v9 }
  0x53   : > { %278 = vxpose.xlu1.b32.cont [2/16] (narrow) %v198_v18, 8  ;;  %v1118_v18 = vstv %s805_s20 }
  0x55   : > { %256 = vxpose.xlu0.b32.cont [12/16] (narrow) %v192_v17, 8 }
  0x57   : > { %279 = vxpose.xlu1.b32.cont [3/16] (narrow) %v199_v20, 8  ;;  %v1123_v20 = vstv %s806_s21 }
  0x59   : > { %257 = vxpose.xlu0.b32.cont [13/16] (narrow) %v193_v19, 8  ;;  %v1121_v19 = vsub.s32 2, %v1102_v9 }
  0x5b   : > { %280 = vxpose.xlu1.b32.cont [4/16] (narrow) %v200_v22, 8 }
  0x5d   : > { %258 = vxpose.xlu0.b32.cont [14/16] (narrow) %v194_v21, 8 }
  0x5f   : > { %281 = vxpose.xlu1.b32.cont [5/16] (narrow) %v201_v24, 8 }
  0x61   : > { %259 = vxpose.xlu0.b32.cont [15/16] (narrow) %v195_v23, 8 }
  0x63   : > { %282 = vxpose.xlu1.b32.cont [6/16] (narrow) %v202_v26, 8  ;;  %v1134_v26 = vsub.s32 3, %v1102_v9 }
  0x65   : > { %260 = vxpose.xlu0.b32.end [16/16] (narrow) %v196_v25, 8  ;;  %v1131_v25 = vadd.s32 8, %v1102_v9 }
  0x67   : > { %283 = vxpose.xlu1.b32.cont [7/16] (narrow) %v203_v28, 8 }
  0x69   : > { %309 = vxpose.xlu0.b32.start [1/16] (narrow) %v213_v27, 8 }
  0x6b   : > { %284 = vxpose.xlu1.b32.cont [8/16] (narrow) %v204_v30, 8  ;;  %v1141_v30 = vadd.s32 16, %v1102_v9 }
  0x6d   : > { %310 = vxpose.xlu0.b32.cont [2/16] (narrow) %v214_v29, 8 }
  0x6f   : > { %285 = vxpose.xlu1.b32.cont [9/16] (narrow) %v205_v32, 8 }
  0x71   : > { %311 = vxpose.xlu0.b32.cont [3/16] (narrow) %v215_v31, 8 }
  0x73   : > { %286 = vxpose.xlu1.b32.cont [10/16] (narrow) %v206_v34, 8 }
  0x75   : > { %312 = vxpose.xlu0.b32.cont [4/16] (narrow) %v216_v33, 8 }
  0x77   : > { %287 = vxpose.xlu1.b32.cont [11/16] (narrow) %v207_v36, 8 }
  0x79   : > { %313 = vxpose.xlu0.b32.cont [5/16] (narrow) %v217_v35, 8 }
  0x7b   : > { %288 = vxpose.xlu1.b32.cont [12/16] (narrow) %v208_v38, 8 }
  0x7d   : > { %314 = vxpose.xlu0.b32.cont [6/16] (narrow) %v218_v37, 8 }
  0x7f   : > { %289 = vxpose.xlu1.b32.cont [13/16] (narrow) %v209_v40, 8 }
  0x81   : > { %315 = vxpose.xlu0.b32.cont [7/16] (narrow) %v219_v39, 8 }
  0x83   : > { %290 = vxpose.xlu1.b32.cont [14/16] (narrow) %v210_v42, 8 }
  0x85   : > { %316 = vxpose.xlu0.b32.cont [8/16] (narrow) %v220_v41, 8 }
  0x87   : > { %291 = vxpose.xlu1.b32.cont [15/16] (narrow) %v211_v44, 8 }
  0x89   : > { %317 = vxpose.xlu0.b32.cont [9/16] (narrow) %v221_v43, 8 }
  0x8b   : > { %292 = vxpose.xlu1.b32.end [16/16] (narrow) %v212_v46, 8 }
  0x8d   : > { %318 = vxpose.xlu0.b32.cont [10/16] (narrow) %v222_v45, 8 }
  0x8f   : > { %341 = vxpose.xlu1.b32.start [1/16] (narrow) %v229_v48, 8 }
  0x91   : > { %319 = vxpose.xlu0.b32.cont [11/16] (narrow) %v223_v47, 8 }
  0x93   : > { %342 = vxpose.xlu1.b32.cont [2/16] (narrow) %v230_v50, 8 }
  0x95   : > { %320 = vxpose.xlu0.b32.cont [12/16] (narrow) %v224_v49, 8 }
  0x97   : > { %343 = vxpose.xlu1.b32.cont [3/16] (narrow) %v231_v52, 8 }
  0x99   : > { %321 = vxpose.xlu0.b32.cont [13/16] (narrow) %v225_v51, 8 }
  0x9b   : > { %344 = vxpose.xlu1.b32.cont [4/16] (narrow) %v232_v54, 8 }
  0x9d   : > { %322 = vxpose.xlu0.b32.cont [14/16] (narrow) %v226_v53, 8  ;;  %v1099_v8 = vpop.permute.xlu1 %614 }
  0x9f   : > { %345 = vxpose.xlu1.b32.cont [5/16] (narrow) %v233_v56, 8 }
  0xa1   : > { %323 = vxpose.xlu0.b32.cont [15/16] (narrow) %v227_v55, 8  ;;  %v1108_v13 = vpop.permute.xlu1 %619 }
  0xa3   : > { %346 = vxpose.xlu1.b32.cont [6/16] (narrow) %v234_v58, 8 }
  0xa5   : > { %324 = vxpose.xlu0.b32.end [16/16] (narrow) %v228_v57, 8  ;;  %v1128_v24 = vpop.permute.xlu1 %624 }
  0xa7   : > { %347 = vxpose.xlu1.b32.cont [7/16] (narrow) %v235_v59, 8 }
  0xa9   : > { %v261_v12 = vpop.trf.xlu0 }
  0xaa   : > { %v375_v16 = vadd.s32 %v1104_v10, %v261_v12  ;;  %v381_v17 = vadd.s32 %v1106_v11, %v261_v12  ;;  %v387_v21 = vadd.s32 %v1118_v18, %v261_v12  ;;  %v393_v27 = vadd.s32 %v1123_v20, %v261_v12 }
  0xab   : > { %348 = vxpose.xlu1.b32.cont [8/16] (narrow) %v236_v60, 8 }
  0xac   : > { %v404_v22 = vrot.slane %v375_v16, %v1111_v14  ;;  %v444_v23 = vrot.slane %v381_v17, %v1114_v15  ;;  %v496_v28 = vrot.slane %v387_v21, %v1121_v19  ;;  %v548_v31 = vrot.slane %v393_v27, %v1134_v26 }
  0xae   : > { %vm417_vm0 = vcmp.eq.s32.totalorder %v1102_v9, %v404_v22  ;;  %vm457_vm1 = vcmp.eq.s32.totalorder %v1102_v9, %v444_v23  ;;  %vm421_vm2 = vcmp.eq.s32.totalorder %v1131_v25, %v404_v22  ;;  %vm461_vm3 = vcmp.eq.s32.totalorder %v1131_v25, %v444_v23 }
  0xaf   : > { %349 = vxpose.xlu1.b32.cont [9/16] (narrow) %v237_v61, 8  ;;  %v429_v32 = vsel %vm417_vm0, 1, %v936_v2  ;;  %v469_v33 = vsel %vm457_vm1, 1, %v936_v2  ;;  %vm509_vm4 = vcmp.eq.s32.totalorder %v1102_v9, %v496_v28  ;;  %vm425_vm5 = vcmp.eq.s32.totalorder %v1141_v30, %v404_v22 }
  0xb0   : > { %vm465_vm6 = vcmp.eq.s32.totalorder %v1141_v30, %v444_v23  ;;  %v481_v36 = vadd.s32 %v469_v33, %v429_v32  ;;  %v521_v37 = vsel %vm509_vm4, 1, %v936_v2  ;;  %vm561_vm7 = vcmp.eq.s32.totalorder %v1102_v9, %v548_v31 }
  0xb1   : > { %v433_v38 = vsel %vm421_vm2, 1, %v936_v2  ;;  %v473_v39 = vsel %vm461_vm3, 1, %v936_v2  ;;  %vm513_vm8 = vcmp.eq.s32.totalorder %v1131_v25, %v496_v28  ;;  %vm565_vm9 = vcmp.eq.s32.totalorder %v1131_v25, %v548_v31 }
  0xb2   : > { %v533_v43 = vadd.s32 %v521_v37, %v481_v36  ;;  %v485_v44 = vadd.s32 %v473_v39, %v433_v38  ;;  %v573_v45 = vsel %vm561_vm7, 1, %v936_v2  ;;  %v525_v46 = vsel %vm513_vm8, 1, %v936_v2 }
  0xb3   : > { %350 = vxpose.xlu1.b32.cont [10/16] (narrow) %v238_v62, 8  ;;  %v437_v47 = vsel %vm425_vm5, 1, %v936_v2  ;;  %v477_v48 = vsel %vm465_vm6, 1, %v936_v2  ;;  %v577_v50 = vsel %vm565_vm9, 1, %v936_v2  ;;  %vm517_vm14 = vcmp.eq.s32.totalorder %v1141_v30, %v496_v28 }
  0xb4   : > { %v1177_v53 = vadd.s32 %v573_v45, %v533_v43  ;;  %v537_v54 = vadd.s32 %v525_v46, %v485_v44  ;;  %v489_v55 = vadd.s32 %v477_v48, %v437_v47  ;;  %v529_v61 = vsel %vm517_vm14, 1, %v936_v2 }
  0xb5   : > { %vm569_vm2 = vcmp.eq.s32.totalorder %v1141_v30, %v548_v31 }
  0xb6   : > { %v1201_v12 = vadd.s32 %v529_v61, %v489_v55  ;;  %v1207_v22 = vsel %vm569_vm2, 1, %v936_v2 }
  0xb7   : > { %351 = vxpose.xlu1.b32.cont [11/16] (narrow) %v239_v63, 8 }
  0xbb   : > { %352 = vxpose.xlu1.b32.cont [12/16] (narrow) %v240_v0, 8 }
  0xbf   : > { %353 = vxpose.xlu1.b32.cont [13/16] (narrow) %v241_v1, 8 }
  0xc3   : > { %354 = vxpose.xlu1.b32.cont [14/16] (narrow) %v242_v3, 8 }
  0xc7   : > { %355 = vxpose.xlu1.b32.cont [15/16] (narrow) %v243_v4, 8  ;;  %v1197_v4 = vadd.s32 %v577_v50, %v537_v54 }
  0xcb   : > { %356 = vxpose.xlu1.b32.end [16/16] (narrow) %v244_v6, 8 }
  0xce   : > { %856 = vset.pattern.permute.xlu0 %v936_v2 }
  0xcf   : > { %678 = vperm.xlu0 %856, %v675_v5   ;;  %v293_v29 = vpop.trf.xlu1 }
  0xd0   : > { %v376_v34 = vadd.s32 %v1104_v10, %v293_v29  ;;  %v382_v35 = vadd.s32 %v1106_v11, %v293_v29  ;;  %v388_v40 = vadd.s32 %v1118_v18, %v293_v29  ;;  %v394_v51 = vadd.s32 %v1123_v20, %v293_v29 }
  0xd2   : > { %v408_v41 = vrot.slane %v376_v34, %v1111_v14  ;;  %v448_v42 = vrot.slane %v382_v35, %v1114_v15  ;;  %v500_v49 = vrot.slane %v388_v40, %v1121_v19  ;;  %v1192_v62 = vrot.slane %v394_v51, %v1134_v26 }
  0xd4   : > { %vm418_vm10 = vcmp.eq.s32.totalorder %v1102_v9, %v408_v41  ;;  %vm458_vm11 = vcmp.eq.s32.totalorder %v1102_v9, %v448_v42  ;;  %vm422_vm12 = vcmp.eq.s32.totalorder %v1131_v25, %v408_v41  ;;  %vm462_vm13 = vcmp.eq.s32.totalorder %v1131_v25, %v448_v42 }
  0xd5   : > { %vm426_vm15 = vcmp.eq.s32.totalorder %v1141_v30, %v408_v41  ;;  %v430_v56 = vsel %vm418_vm10, 1, %v936_v2  ;;  %vm466_vm0 = vcmp.eq.s32.totalorder %v1141_v30, %v448_v42  ;;  %v470_v57 = vsel %vm458_vm11, 1, %v936_v2 }
  0xd6   : > { %v434_v58 = vsel %vm422_vm12, 1, %v936_v2  ;;  %v474_v59 = vsel %vm462_vm13, 1, %v936_v2  ;;  %vm510_vm1 = vcmp.eq.s32.totalorder %v1102_v9, %v500_v49  ;;  %vm514_vm3 = vcmp.eq.s32.totalorder %v1131_v25, %v500_v49 }
  0xd7   : > { %v438_v63 = vsel %vm426_vm15, 1, %v936_v2  ;;  %v478_v0 = vsel %vm466_vm0, 1, %v936_v2  ;;  %v482_v1 = vadd.s32 %v470_v57, %v430_v56  ;;  %v486_v5 = vadd.s32 %v474_v59, %v434_v58 }
  0xd8   : > { %vm518_vm4 = vcmp.eq.s32.totalorder %v1141_v30, %v500_v49  ;;  %v522_v6 = vsel %vm510_vm1, 1, %v936_v2  ;;  %v526_v16 = vsel %vm514_vm3, 1, %v936_v2  ;;  %v1209_v23 = vadd.s32 %v478_v0, %v438_v63 }
  0xd9   : > { %vm562_vm5 = vcmp.eq.s32.totalorder %v1102_v9, %v1192_v62  ;;  %vm566_vm6 = vcmp.eq.s32.totalorder %v1131_v25, %v1192_v62  ;;  %v1216_v27 = vsel %vm518_vm4, 1, %v936_v2  ;;  %v1218_v28 = vadd.s32 %v522_v6, %v482_v1 }
  0xda   : > { %v1222_v33 = vadd.s32 %v526_v16, %v486_v5  ;;  %v574_v37 = vsel %vm562_vm5, 1, %v936_v2  ;;  %v578_v38 = vsel %vm566_vm6, 1, %v936_v2 }
  0xdb   : > { %v586_v6 = vadd.s32 %v574_v37, %v1218_v28  ;;  %v597_v28 = vcvt.s32.f32 %v1177_v53  ;;  %v593_v37 = vadd.s32 %v1207_v22, %v1201_v12 }
  0xdc   : > { %v590_v16 = vadd.s32 %v578_v38, %v1222_v33  ;;  %v601_v33 = vcvt.s32.f32 %v1197_v4  ;;  %v542_v38 = vadd.s32 %v1216_v27, %v1209_v23 }
  0xdd   : > { %v627_v27 = vmul.f32 %v1099_v8, %v597_v28 }
  0xe9   : > { %v325_v52 = vpop.trf.xlu0 }
  0xea   : > { %v377_v60 = vadd.s32 %v1104_v10, %v325_v52  ;;  %v383_v3 = vadd.s32 %v1106_v11, %v325_v52  ;;  %v389_v17 = vadd.s32 %v1118_v18, %v325_v52  ;;  %v395_v29 = vadd.s32 %v1123_v20, %v325_v52 }
  0xec   : > { %v412_v21 = vrot.slane %v377_v60, %v1111_v14  ;;  %v452_v31 = vrot.slane %v383_v3, %v1114_v15  ;;  %v504_v39 = vrot.slane %v389_v17, %v1121_v19 }
  0xee   : > { %vm419_vm7 = vcmp.eq.s32.totalorder %v1102_v9, %v412_v21  ;;  %vm423_vm8 = vcmp.eq.s32.totalorder %v1131_v25, %v412_v21  ;;  %vm427_vm9 = vcmp.eq.s32.totalorder %v1141_v30, %v412_v21  ;;  %vm459_vm10 = vcmp.eq.s32.totalorder %v1102_v9, %v452_v31 }
  0xef   : > { %vm463_vm11 = vcmp.eq.s32.totalorder %v1131_v25, %v452_v31  ;;  %v431_v42 = vsel %vm419_vm7, 1, %v936_v2  ;;  %v439_v43 = vsel %vm427_vm9, 1, %v936_v2  ;;  %v471_v44 = vsel %vm459_vm10, 1, %v936_v2 }
  0xf0   : > { %vm511_vm0 = vcmp.eq.s32.totalorder %v1102_v9, %v504_v39  ;;  %vm515_vm1 = vcmp.eq.s32.totalorder %v1131_v25, %v504_v39  ;;  %vm467_vm2 = vcmp.eq.s32.totalorder %v1141_v30, %v452_v31  ;;  %v483_v49 = vadd.s32 %v471_v44, %v431_v42 }
  0xf1   : > { %v523_v51 = vsel %vm511_vm0, 1, %v936_v2  ;;  %v527_v52 = vsel %vm515_vm1, 1, %v936_v2  ;;  %v479_v56 = vsel %vm467_vm2, 1, %v936_v2  ;;  %v631_v44 = vmul.f32 %v1108_v13, %v601_v33 }
  0xf2   : > { %v535_v58 = vadd.s32 %v523_v51, %v483_v49  ;;  %v491_v17 = vadd.s32 %v479_v56, %v439_v43  ;;  %vm720_vm0 = vcmp.lt.s32.totalorder %v397_v7, 512 }
 0x10f   : > { %v357_v32 = vpop.trf.xlu1 }
 0x110   : > { %v378_v34 = vadd.s32 %v1104_v10, %v357_v32  ;;  %v384_v35 = vadd.s32 %v1106_v11, %v357_v32  ;;  %v390_v36 = vadd.s32 %v1118_v18, %v357_v32  ;;  %v1238_v11 = vrot.slane %v395_v29, %v1134_v26 }
 0x111   : > { %v396_v18 = vadd.s32 %v1123_v20, %v357_v32  ;;  %v475_v20 = vsel %vm463_vm11, 1, %v936_v2 }
 0x112   : > { %v416_v40 = vrot.slane %v378_v34, %v1111_v14  ;;  %v456_v10 = vrot.slane %v384_v35, %v1114_v15  ;;  %v508_v41 = vrot.slane %v390_v36, %v1121_v19  ;;  %v435_v15 = vsel %vm423_vm8, 1, %v936_v2 }
 0x113   : > { %v560_v48 = vrot.slane %v396_v18, %v1134_v26  ;;  %v487_v50 = vadd.s32 %v475_v20, %v435_v15  ;;  %vm563_vm7 = vcmp.eq.s32.totalorder %v1102_v9, %v1238_v11  ;;  %vm519_vm8 = vcmp.eq.s32.totalorder %v1141_v30, %v504_v39 }
 0x114   : > { %vm420_vm12 = vcmp.eq.s32.totalorder %v1102_v9, %v416_v40  ;;  %vm424_vm13 = vcmp.eq.s32.totalorder %v1131_v25, %v416_v40  ;;  %vm460_vm14 = vcmp.eq.s32.totalorder %v1102_v9, %v456_v10  ;;  %vm464_vm15 = vcmp.eq.s32.totalorder %v1131_v25, %v456_v10 }
 0x115   : > { %v432_v45 = vsel %vm420_vm12, 1, %v936_v2  ;;  %v436_v19 = vsel %vm424_vm13, 1, %v936_v2  ;;  %v472_v46 = vsel %vm460_vm14, 1, %v936_v2  ;;  %v476_v47 = vsel %vm464_vm15, 1, %v936_v2 }
 0x116   : > { %vm512_vm3 = vcmp.eq.s32.totalorder %v1102_v9, %v508_v41  ;;  %vm516_vm4 = vcmp.eq.s32.totalorder %v1131_v25, %v508_v41  ;;  %vm428_vm5 = vcmp.eq.s32.totalorder %v1141_v30, %v416_v40  ;;  %vm468_vm6 = vcmp.eq.s32.totalorder %v1141_v30, %v456_v10 }
 0x117   : > { %v484_v54 = vadd.s32 %v472_v46, %v432_v45  ;;  %v488_v55 = vadd.s32 %v476_v47, %v436_v19  ;;  %v524_v57 = vsel %vm512_vm3, 1, %v936_v2  ;;  %v528_v26 = vsel %vm516_vm4, 1, %v936_v2 }
 0x118   : > { %vm567_vm9 = vcmp.eq.s32.totalorder %v1131_v25, %v1238_v11  ;;  %vm564_vm10 = vcmp.eq.s32.totalorder %v1102_v9, %v560_v48  ;;  %vm568_vm11 = vcmp.eq.s32.totalorder %v1131_v25, %v560_v48  ;;  %v539_v59 = vadd.s32 %v527_v52, %v487_v50 }
 0x119   : > { %v440_v60 = vsel %vm428_vm5, 1, %v936_v2  ;;  %v480_v61 = vsel %vm468_vm6, 1, %v936_v2  ;;  %v575_v63 = vsel %vm563_vm7, 1, %v936_v2  ;;  %vm520_vm12 = vcmp.eq.s32.totalorder %v1141_v30, %v508_v41 }
 0x11a   : > { %v536_v0 = vadd.s32 %v524_v57, %v484_v54  ;;  %v540_v1 = vadd.s32 %v528_v26, %v488_v55  ;;  %vm570_vm13 = vcmp.eq.s32.totalorder %v1141_v30, %v1192_v62  ;;  %v579_v3 = vsel %vm567_vm9, 1, %v936_v2 }
 0x11b   : > { %v576_v5 = vsel %vm564_vm10, 1, %v936_v2  ;;  %v580_v25 = vsel %vm568_vm11, 1, %v936_v2  ;;  %v492_v21 = vadd.s32 %v480_v61, %v440_v60  ;;  %v531_v29 = vsel %vm519_vm8, 1, %v936_v2 }
 0x11c   : > { %vm571_vm14 = vcmp.eq.s32.totalorder %v1141_v30, %v1238_v11  ;;  %v587_v31 = vadd.s32 %v575_v63, %v535_v58  ;;  %v532_v32 = vsel %vm520_vm12, 1, %v936_v2  ;;  %v591_v34 = vadd.s32 %v579_v3, %v539_v59 }
 0x11d   : > { %vm572_vm15 = vcmp.eq.s32.totalorder %v1141_v30, %v560_v48  ;;  %v588_v35 = vadd.s32 %v576_v5, %v536_v0  ;;  %v592_v36 = vadd.s32 %v580_v25, %v540_v1  ;;  %v582_v39 = vsel %vm570_vm13, 1, %v936_v2 }
 0x11e   : > { %v543_v40 = vadd.s32 %v531_v29, %v491_v17  ;;  %v544_v10 = vadd.s32 %v532_v32, %v492_v21  ;;  %v598_v18 = vcvt.s32.f32 %v586_v6  ;;  %v602_v41 = vcvt.s32.f32 %v590_v16 }
 0x11f   : > { %v583_v53 = vsel %vm571_vm14, 1, %v936_v2  ;;  %v584_v4 = vsel %vm572_vm15, 1, %v936_v2  ;;  %v599_v12 = vcvt.s32.f32 %v587_v31  ;;  %v603_v22 = vcvt.s32.f32 %v591_v34 }
 0x120   : > { %v600_v42 = vcvt.s32.f32 %v588_v35  ;;  %v604_v23 = vcvt.s32.f32 %v592_v36  ;;  %v594_v15 = vadd.s32 %v582_v39, %v542_v38  ;;  %v595_v62 = vadd.s32 %v583_v53, %v543_v40 }
 0x121   : > { %v596_v43 = vadd.s32 %v584_v4, %v544_v10  ;;  %v605_v20 = vcvt.s32.f32 %v593_v37  ;;  %v628_v45 = vmul.f32 %v1099_v8, %v598_v18  ;;  %v632_v19 = vmul.f32 %v1108_v13, %v602_v41 }
 0x122   : > { %v629_v30 = vmul.f32 %v1099_v8, %v599_v12  ;;  %v633_v2 = vmul.f32 %v1108_v13, %v603_v22  ;;  %v630_v11 = vmul.f32 %v1099_v8, %v600_v42  ;;  %v634_v46 = vmul.f32 %v1108_v13, %v604_v23 }
 0x123   : > { %v606_v47 = vcvt.s32.f32 %v594_v15  ;;  %v607_v48 = vcvt.s32.f32 %v595_v62  ;;  %v608_v49 = vcvt.s32.f32 %v596_v43  ;;  %v639_v50 = vadd.f32 %v631_v44, %v627_v27 }
 0x124   : > { %v635_v51 = vmul.f32 %v1128_v24, %v605_v20  ;;  %v663_v52 = vadd.f32 %v634_v46, %v630_v11  ;;  %v647_v54 = vadd.f32 %v632_v19, %v628_v45  ;;  %v655_v55 = vadd.f32 %v633_v2, %v629_v30 }
 0x125   : > { %v636_v56 = vmul.f32 %v1128_v24, %v606_v47  ;;  %v637_v57 = vmul.f32 %v1128_v24, %v607_v48  ;;  %v638_v26 = vmul.f32 %v1128_v24, %v608_v49  ;;  %v937_v34 = vmov 1966171168  }
 0x126   : > { %v640_v58 = vadd.f32 %v639_v50, %v635_v51  ;;  %v696_v35 = vunpack.c.l.s4 %v937_v34 }
 0x127   : > { %v648_v59 = vadd.f32 %v647_v54, %v636_v56  ;;  %v656_v8 = vadd.f32 %v655_v55, %v637_v57  ;;  %v664_v60 = vadd.f32 %v663_v52, %v638_v26 }
 0x128   : > { %v641_v13 = vrot.slane %v640_v58, 4  ;;  %v697_v38 = vunpack.c.0.s8 %v696_v35 }
 0x129   : > { %v649_v61 = vrot.slane %v648_v59, 4  ;;  %v657_v63 = vrot.slane %v656_v8, 4  ;;  %v665_v0 = vrot.slane %v664_v60, 4 }
 0x12a   : > { %v642_v1 = vadd.f32 %v641_v13, %v640_v58  ;;  %v700_v4 = vsub.s32 %v697_v38, %v1102_v9 }
 0x12b   : > { %v650_v3 = vadd.f32 %v649_v61, %v648_v59  ;;  %v658_v5 = vadd.f32 %v657_v63, %v656_v8  ;;  %v666_v25 = vadd.f32 %v665_v0, %v664_v60 }
 0x12c   : > { %v643_v6 = vrot.slane %v642_v1, 2 }
 0x12d   : > { %v651_v16 = vrot.slane %v650_v3, 2  ;;  %v659_v17 = vrot.slane %v658_v5, 2  ;;  %v667_v21 = vrot.slane %v666_v25, 2 }
 0x12e   : > { %v644_v29 = vadd.f32 %v643_v6, %v642_v1 }
 0x12f   : > { %v652_v31 = vadd.f32 %v651_v16, %v650_v3  ;;  %v660_v24 = vadd.f32 %v659_v17, %v658_v5  ;;  %v668_v32 = vadd.f32 %v667_v21, %v666_v25 }
 0x130   : > { %v645_v36 = vrot.slane %v644_v29, 1 }
 0x131   : > { %v653_v28 = vrot.slane %v652_v31, 1  ;;  %v661_v33 = vrot.slane %v660_v24, 1  ;;  %v669_v37 = vrot.slane %v668_v32, 1 }
 0x132   : > { %v646_v39 = vadd.f32 %v645_v36, %v644_v29 }
 0x133   : > { %v654_v10 = vadd.f32 %v653_v28, %v652_v31  ;;  %v662_v18 = vadd.f32 %v661_v33, %v660_v24  ;;  %v670_v41 = vadd.f32 %v669_v37, %v668_v32 }
 0x14e   : > { %v679_v40 = vpop.permute.xlu0 %678 }
 0x14f   : > { %v684_v53 = vrot.slane %v679_v40, %v1111_v14 }
 0x151   : > { %v685_v12 = vadd.f32 %v684_v53, %v646_v39  ;;  %v686_v22 = vadd.f32 %v684_v53, %v654_v10  ;;  %v687_v42 = vadd.f32 %v684_v53, %v662_v18  ;;  %v688_v23 = vadd.f32 %v684_v53, %v670_v41 }
 0x153   : > { %v693_v27 = vcombine.low %v685_v12, %v686_v22  ;;  %v694_v15 = vcombine.low %v687_v42, %v688_v23 }
 0x155   : > { %v701_v62 = vrot.slane %v693_v27, %v700_v4  ;;  %v708_v43 = vrot.slane %v694_v15, %v700_v4 }
 0x157   : > { %v709_v44 = vcombine.low %v701_v62, %v708_v43 }
 0x159   : > { %v716_v20 = vrot.slane %v709_v44, %v700_v4 }
 0x15b   : > { %722 = vst.msk [vmem:[%s173_s27] sm:$0xf] %vm720_vm0, %v716_v20 }
 0x15c   : > { %882 = shalt.err (!%p879_p8)
}
 0x15d   : > { %s883_s8 = scalar_lea.hbm %s1328_s9, 64  ;;  %s887_s17 = scalar_lea.hbm %s1373_s4, 128 }
 0x15e   : > { %p884_p9 = scmp.ne.s32.totalorder %s1328_s9, %s883_s8  ;;  %p888_p0 = scmp.lt.u32.totalorder %s1328_s9, %s1373_s4 }
 0x15f   : > { %p889_p1 = scmp.lt.u32.totalorder %s887_s17, %s883_s8  ;;  %p891_p3 = scmp.lt.u32.totalorder %s883_s8, %s1328_s9 }
 0x160   : > { %p885_p12 = pnand %p884_p9, %p1005_p10 }
 0x161   : > { %p890_p2 = por %p889_p1, %p888_p0 }
 0x162   : > { %p886_p13 = pneg %p885_p12 }
 0x163   : > { %p892_p4 = por %p891_p3, %p890_p2 }
 0x165   : > { %p893_p5 = pnand %p892_p4, %p886_p13 }
 0x167   : > { %896 = shalt.err (!%p893_p5)
}
 0x168   : > { %813 = dma.vmem_to_hbm [thread:$0]  (%p1005_p10), %s1330_s28, 64, %s1328_s9, %s724_s10  }
 0x169 PF: > { %p819_p6 = scmp.ge.s32.totalorder %s933_s23, 2  ;;  %s750_s20 = sand.u32 1, %s921_s0  }
 0x16a   : > { %s751_s21 = scalar_lea.sflag [#allocation6], %s750_s20 }
 0x16b   : > { %p816_p7 = pnand %p819_p6, %p1009_p11 }
 0x16d   : > { %916 = dma.done.wait (!%p816_p7), %s751_s21, 64  }
 0x16e   : > { %918 = vsyncadd (!%p816_p7), %s751_s21, 4294967232  ;;  %p22_p8 = scmp.ge.s32.totalorder %s993_s26, 4   ;;  %s1377_s0 = smov %s925_s22 }
 0x16f   : > { %s1378_s22 = smov %s929_s3  ;;  %s1379_s3 = smov %s1003_s29 }
 0x170   : > { %s1380_s23 = smov %s993_s26  ;;  %24 = sbr.rel (!%p22_p8) target bundleno = 18 (0x12), region = 67 }
 0x177   :  { %756 = vsyncpa [#allocation6], 1 }
 0x178   :  { %758 = vsyncpa [#allocation6 + $0x1], 1 }

</bundles_post_ra>
